<compile_context>
chip_gen: v5e
topology: v5e:2x2
jax: 0.10.0
libtpu: 0.0.40
codegen_flags: <defaults>
</compile_context>

<pallas_src>
import jax
import jax.numpy as jnp
import numpy as np
from jax import lax
from jax.experimental import pallas as pl
from jax.experimental.pallas import tpu as pltpu


def _agent_encoder_kernel(rel_ref, lens_ref, wx_ref, bx_ref, whh_ref,
                          out_ref, xg_ref):
    T, Bt, K = rel_ref.shape          # K = feature dim zero-padded to 8
    H = out_ref.shape[1]
    G = whh_ref.shape[1]              # 4 * H

    # ---- one-shot input projection for ALL timesteps (single MXU matmul),
    #      staged into VMEM scratch so the time loop only slices one step. ----
    rel2d = rel_ref[...].reshape(T * Bt, K).astype(jnp.bfloat16)
    xg = jnp.dot(rel2d, wx_ref[...], preferred_element_type=jnp.float32)
    xg_ref[...] = (xg + bx_ref[...]).reshape(T, Bt, G)

    whh = whh_ref[...]                                   # (H, 4H) bf16
    # pack_padded lengths, lane-broadcast hoisted out of the loop.
    lens_b = jnp.broadcast_to(lens_ref[...], (Bt, H))    # (Bt, H) int32

    def step(t, carry):
        h, c = carry
        gates = xg_ref[t] + jnp.dot(h.astype(jnp.bfloat16), whh,
                                    preferred_element_type=jnp.float32)
        # permuted gate layout [i, f, o | g]: one sigmoid + one tanh.
        sig = jax.nn.sigmoid(gates[:, :3 * H])
        g_g = jnp.tanh(gates[:, 3 * H:])
        i_g = sig[:, 0 * H:1 * H]
        f_g = sig[:, 1 * H:2 * H]
        o_g = sig[:, 2 * H:3 * H]
        c_new = f_g * c + i_g * g_g
        h_new = o_g * jnp.tanh(c_new)
        keep = lens_b > t                                # freeze at t >= len
        h = jnp.where(keep, h_new, h)
        c = jnp.where(keep, c_new, c)
        return h, c

    h0 = jnp.zeros((Bt, H), jnp.float32)
    c0 = jnp.zeros((Bt, H), jnp.float32)
    h, _ = lax.fori_loop(0, T, step, (h0, c0), unroll=True)
    out_ref[...] = h


def _round_up(x, m):
    return (x + m - 1) // m * m


def agent_encoder_lstm(obs_traj, src_lens, params, *, tile_b=256):
    """obs_traj: (T, B, D) f32, src_lens: (B,) int (sorted descending)."""
    T, B, D = obs_traj.shape
    H = params["w_hh"].shape[0]
    G = 4 * H
    K = 8                                  # feature dim padded for the MXU

    def permute_gates(w):                  # PyTorch [i, f, g, o] -> [i, f, o, g]
        i, f, g, o = jnp.split(w, 4, axis=-1)
        return jnp.concatenate([i, f, o, g], axis=-1)

    # Fold the (activation-free) spatial embedding into the LSTM input
    # projection and permute gate columns.
    w_x = permute_gates(params["w_emb"] @ params["w_ih"])                # (D, 4H)
    b_x = permute_gates((params["b_emb"] @ params["w_ih"]
                         + params["b_ih"] + params["b_hh"]).reshape(1, G))
    w_hh = permute_gates(params["w_hh"])                                 # (H, 4H)

    w_x = jnp.pad(w_x, ((0, K - D), (0, 0))).astype(jnp.bfloat16)        # (8, 4H)
    w_hh = w_hh.astype(jnp.bfloat16)
    b_x = b_x.astype(jnp.float32)

    # rel[0] = 0, rel[t] = obs[t] - obs[t-1]; zero-pad the feature dim to K.
    obs = obs_traj.astype(jnp.float32)
    rel = jnp.concatenate(
        [jnp.zeros((1, B, D), jnp.float32), obs[1:] - obs[:-1]], axis=0)
    rel = jnp.pad(rel, ((0, 0), (0, 0), (0, K - D)))                     # (T, B, 8)

    # ---- batch tiling: big sublane tiles, >= 2 grid steps when possible ----
    B8 = _round_up(B, 8)
    tile = _round_up(min(tile_b, B8), 8)
    if B8 // tile < 2 and B8 >= 16:        # v7x megacore: keep nb >= 2
        tile = _round_up(pl.cdiv(B8, 2), 8)
    B_pad = _round_up(B, tile)
    nb = B_pad // tile
    pad = B_pad - B

    rel = jnp.pad(rel, ((0, 0), (0, pad), (0, 0)))
    lens = jnp.pad(src_lens.astype(jnp.int32), (0, pad)).reshape(B_pad, 1)

    out = pl.pallas_call(
        _agent_encoder_kernel,
        out_shape=jax.ShapeDtypeStruct((B_pad, H), jnp.float32),
        grid=(nb,),
        in_specs=[
            pl.BlockSpec((T, tile, K), lambda b: (0, b, 0)),   # rel (f32)
            pl.BlockSpec((tile, 1), lambda b: (b, 0)),         # lengths (i32)
            pl.BlockSpec((K, G), lambda b: (0, 0)),            # W_x (bf16)
            pl.BlockSpec((1, G), lambda b: (0, 0)),            # b_x (f32)
            pl.BlockSpec((H, G), lambda b: (0, 0)),            # W_hh (bf16)
        ],
        out_specs=pl.BlockSpec((tile, H), lambda b: (b, 0)),
        scratch_shapes=[pltpu.VMEM((T, tile, G), jnp.float32)],  # staged x_gates
        compiler_params=pltpu.CompilerParams(
            dimension_semantics=("parallel",),
            vmem_limit_bytes=48 * 1024 * 1024),
    )(rel, lens, w_x, b_x, w_hh)

    return out[:B].reshape(1, B, H)        # (num_layers, batch, h_dim)


def reference(obs, lens, params):
    """Pure-JAX f32 reference mirroring the PyTorch forward (unfolded weights)."""
    T, B, D = obs.shape
    H = params["w_hh"].shape[0]
    rel = jnp.concatenate(
        [jnp.zeros((1, B, D), obs.dtype), obs[1:] - obs[:-1]], axis=0)
    emb = rel @ params["w_emb"] + params["b_emb"]
    bias = params["b_ih"] + params["b_hh"]

    def step(carry, inp):
        h, c = carry
        x, t = inp
        gates = x @ params["w_ih"] + h @ params["w_hh"] + bias
        i = jax.nn.sigmoid(gates[:, :H])
        f = jax.nn.sigmoid(gates[:, H:2 * H])
        g = jnp.tanh(gates[:, 2 * H:3 * H])
        o = jax.nn.sigmoid(gates[:, 3 * H:])
        c_new = f * c + i * g
        h_new = o * jnp.tanh(c_new)
        m = (t < lens)[:, None]
        return (jnp.where(m, h_new, h), jnp.where(m, c_new, c)), None

    (h, _), _ = lax.scan(step,
                         (jnp.zeros((B, H), jnp.float32),
                          jnp.zeros((B, H), jnp.float32)),
                         (emb, jnp.arange(T)))
    return h[None]


if __name__ == "__main__":
    key = jax.random.PRNGKey(0)
    T, B, D, E, H = 8, 4, 2, 32, 32   # seq=8, batch=4, input_dim=2, h_dim=32
    k = jax.random.split(key, 8)

    obs_traj = jax.random.normal(k[0], (T, B, D), jnp.float32)
    # pack_padded_sequence default requires lengths sorted descending
    src_lens = jnp.array([8, 6, 5, 3], jnp.int32)

    s_emb = 1.0 / float(np.sqrt(D))
    s_h = 1.0 / float(np.sqrt(H))
    params = dict(
        w_emb=jax.random.uniform(k[1], (D, E), jnp.float32, -s_emb, s_emb),
        b_emb=jax.random.uniform(k[2], (E,), jnp.float32, -s_emb, s_emb),
        w_ih=jax.random.uniform(k[3], (E, 4 * H), jnp.float32, -s_h, s_h),
        w_hh=jax.random.uniform(k[4], (H, 4 * H), jnp.float32, -s_h, s_h),
        b_ih=jax.random.uniform(k[5], (4 * H,), jnp.float32, -s_h, s_h),
        b_hh=jax.random.uniform(k[6], (4 * H,), jnp.float32, -s_h, s_h),
    )

    hidden_final = jax.block_until_ready(
        agent_encoder_lstm(obs_traj, src_lens, params))
    ref = reference(obs_traj, src_lens, params)
    # bf16 matmul operands (f32 accumulation) over the T-step recurrence:
    # tolerance loosened vs. the pure-f32 reference.
    np.testing.assert_allclose(np.asarray(hidden_final), np.asarray(ref),
                               rtol=2e-2, atol=2e-2)
    print("KERNEL_OK")
</pallas_src>

<mosaic_0001>
module attributes {stable_mosaic.version = 11 : i64} {
  func.func @_agent_encoder_kernel(%arg0: i32, %arg1: memref<8x8x8xf32, #tpu.memory_space<vmem>>, %arg2: memref<8x1xi32, #tpu.memory_space<vmem>>, %arg3: memref<8x128xbf16, #tpu.memory_space<vmem>>, %arg4: memref<1x128xf32, #tpu.memory_space<vmem>>, %arg5: memref<32x128xbf16, #tpu.memory_space<vmem>>, %arg6: memref<8x32xf32, #tpu.memory_space<vmem>>, %arg7: memref<8x8x128xf32, #tpu.memory_space<vmem>>) attributes {dimension_semantics = [#tpu.dimension_semantics<parallel>], iteration_bounds = array<i64: 1>, scalar_prefetch = 0 : i64, scratch_operands = 1 : i64, tpu.core_type = #tpu.core_type<tc>, window_params = [{transform_indices = @transform_0, window_bounds = array<i64: 8, 8, 8>}, {transform_indices = @transform_1, window_bounds = array<i64: 8, 1>}, {pipeline_mode = #tpu.pipeline_mode<synchronous>, transform_indices = @transform_2, window_bounds = array<i64: 8, 128>}, {pipeline_mode = #tpu.pipeline_mode<synchronous>, transform_indices = @transform_3, window_bounds = array<i64: 1, 128>}, {pipeline_mode = #tpu.pipeline_mode<synchronous>, transform_indices = @transform_4, window_bounds = array<i64: 32, 128>}, {transform_indices = @transform_5, window_bounds = array<i64: 8, 32>}]} {
    %c0 = arith.constant 0 : index
    %c0_0 = arith.constant 0 : index
    %c0_1 = arith.constant 0 : index
    %0 = vector.load %arg1[%c0, %c0_0, %c0_1] : memref<8x8x8xf32, #tpu.memory_space<vmem>>, vector<8x8x8xf32>
    %1 = vector.shape_cast %0 : vector<8x8x8xf32> to vector<64x8xf32>
    %2 = arith.truncf %1 : vector<64x8xf32> to vector<64x8xbf16>
    %c0_2 = arith.constant 0 : index
    %c0_3 = arith.constant 0 : index
    %3 = vector.load %arg3[%c0_2, %c0_3] : memref<8x128xbf16, #tpu.memory_space<vmem>>, vector<8x128xbf16>
    %cst = arith.constant dense<0.000000e+00> : vector<64x128xf32>
    %4 = tpu.matmul %2, %3, %cst {dimension_numbers = #tpu.dot_dimension_numbers<[1], [0], [0], [1], [0, 0, 1, 1], [], []>} : vector<64x8xbf16>, vector<8x128xbf16>, vector<64x128xf32> -> vector<64x128xf32>
    %c0_4 = arith.constant 0 : index
    %c0_5 = arith.constant 0 : index
    %5 = vector.load %arg4[%c0_4, %c0_5] : memref<1x128xf32, #tpu.memory_space<vmem>>, vector<1x128xf32>
    %6 = vector.broadcast %5 : vector<1x128xf32> to vector<64x128xf32>
    %7 = arith.addf %4, %6 : vector<64x128xf32>
    %8 = vector.shape_cast %7 : vector<64x128xf32> to vector<8x8x128xf32>
    %c0_6 = arith.constant 0 : index
    %c0_7 = arith.constant 0 : index
    %c0_8 = arith.constant 0 : index
    %9 = vector.load %arg7[%c0_6, %c0_7, %c0_8] : memref<8x8x128xf32, #tpu.memory_space<vmem>>, vector<8x8x128xf32>
    tpu.vector_store %arg7[%c0_6, %c0_7, %c0_8], %8 {strides = array<i32>} : memref<8x8x128xf32, #tpu.memory_space<vmem>>, vector<8x8x128xf32>,
    %c0_9 = arith.constant 0 : index
    %c0_10 = arith.constant 0 : index
    %10 = vector.load %arg5[%c0_9, %c0_10] : memref<32x128xbf16, #tpu.memory_space<vmem>>, vector<32x128xbf16>
    %c0_11 = arith.constant 0 : index
    %c0_12 = arith.constant 0 : index
    %11 = vector.load %arg2[%c0_11, %c0_12] : memref<8x1xi32, #tpu.memory_space<vmem>>, vector<8x1xi32>
    %12 = vector.shape_cast %11 : vector<8x1xi32> to vector<8x1xi32>
    %13 = vector.broadcast %12 : vector<8x1xi32> to vector<8x32xi32>
    %cst_13 = arith.constant 0.000000e+00 : f32
    %14 = vector.broadcast %cst_13 : f32 to vector<8x32xf32>
    %cst_14 = arith.constant 0.000000e+00 : f32
    %15 = vector.broadcast %cst_14 : f32 to vector<8x32xf32>
    %c0_i32 = arith.constant 0 : i32
    %16 = arith.index_cast %c0_i32 : i32 to index
    %c0_15 = arith.constant 0 : index
    %c0_16 = arith.constant 0 : index
    %17 = vector.load %arg7[%16, %c0_15, %c0_16] : memref<8x8x128xf32, #tpu.memory_space<vmem>>, vector<1x8x128xf32>
    %18 = vector.shape_cast %17 : vector<1x8x128xf32> to vector<8x128xf32>
    %19 = arith.truncf %14 : vector<8x32xf32> to vector<8x32xbf16>
    %cst_17 = arith.constant dense<0.000000e+00> : vector<8x128xf32>
    %20 = tpu.matmul %19, %10, %cst_17 {dimension_numbers = #tpu.dot_dimension_numbers<[1], [0], [0], [1], [0, 0, 1, 1], [], []>} : vector<8x32xbf16>, vector<32x128xbf16>, vector<8x128xf32> -> vector<8x128xf32>
    %21 = arith.addf %18, %20 : vector<8x128xf32>
    %22 = vector.extract_strided_slice %21 {offsets = [0, 0], sizes = [8, 96], strides = [1, 1]} : vector<8x128xf32> to vector<8x96xf32>
    %23 = arith.negf %22 : vector<8x96xf32>
    %24 = math.exp %23 : vector<8x96xf32>
    %cst_18 = arith.constant 1.000000e+00 : f32
    %25 = vector.broadcast %cst_18 : f32 to vector<8x96xf32>
    %26 = arith.addf %25, %24 : vector<8x96xf32>
    %27 = arith.divf %25, %26 : vector<8x96xf32>
    %28 = vector.extract_strided_slice %21 {offsets = [0, 96], sizes = [8, 32], strides = [1, 1]} : vector<8x128xf32> to vector<8x32xf32>
    %29 = math.tanh %28 : vector<8x32xf32>
    %30 = vector.extract_strided_slice %27 {offsets = [0, 0], sizes = [8, 32], strides = [1, 1]} : vector<8x96xf32> to vector<8x32xf32>
    %31 = vector.extract_strided_slice %27 {offsets = [0, 32], sizes = [8, 32], strides = [1, 1]} : vector<8x96xf32> to vector<8x32xf32>
    %32 = vector.extract_strided_slice %27 {offsets = [0, 64], sizes = [8, 32], strides = [1, 1]} : vector<8x96xf32> to vector<8x32xf32>
    %33 = arith.mulf %31, %15 : vector<8x32xf32>
    %34 = arith.mulf %30, %29 : vector<8x32xf32>
    %35 = arith.addf %33, %34 : vector<8x32xf32>
    %36 = math.tanh %35 : vector<8x32xf32>
    %37 = arith.mulf %32, %36 : vector<8x32xf32>
    %38 = vector.broadcast %c0_i32 : i32 to vector<8x32xi32>
    %39 = arith.cmpi sgt, %13, %38 : vector<8x32xi32>
    %40 = arith.select %39, %37, %14 : vector<8x32xi1>, vector<8x32xf32>
    %41 = arith.select %39, %35, %15 : vector<8x32xi1>, vector<8x32xf32>
    %c1_i32 = arith.constant 1 : i32
    %42 = arith.index_cast %c1_i32 : i32 to index
    %c0_19 = arith.constant 0 : index
    %c0_20 = arith.constant 0 : index
    %43 = vector.load %arg7[%42, %c0_19, %c0_20] : memref<8x8x128xf32, #tpu.memory_space<vmem>>, vector<1x8x128xf32>
    %44 = vector.shape_cast %43 : vector<1x8x128xf32> to vector<8x128xf32>
    %45 = arith.truncf %40 : vector<8x32xf32> to vector<8x32xbf16>
    %cst_21 = arith.constant dense<0.000000e+00> : vector<8x128xf32>
    %46 = tpu.matmul %45, %10, %cst_21 {dimension_numbers = #tpu.dot_dimension_numbers<[1], [0], [0], [1], [0, 0, 1, 1], [], []>} : vector<8x32xbf16>, vector<32x128xbf16>, vector<8x128xf32> -> vector<8x128xf32>
    %47 = arith.addf %44, %46 : vector<8x128xf32>
    %48 = vector.extract_strided_slice %47 {offsets = [0, 0], sizes = [8, 96], strides = [1, 1]} : vector<8x128xf32> to vector<8x96xf32>
    %49 = arith.negf %48 : vector<8x96xf32>
    %50 = math.exp %49 : vector<8x96xf32>
    %cst_22 = arith.constant 1.000000e+00 : f32
    %51 = vector.broadcast %cst_22 : f32 to vector<8x96xf32>
    %52 = arith.addf %51, %50 : vector<8x96xf32>
    %53 = arith.divf %51, %52 : vector<8x96xf32>
    %54 = vector.extract_strided_slice %47 {offsets = [0, 96], sizes = [8, 32], strides = [1, 1]} : vector<8x128xf32> to vector<8x32xf32>
    %55 = math.tanh %54 : vector<8x32xf32>
    %56 = vector.extract_strided_slice %53 {offsets = [0, 0], sizes = [8, 32], strides = [1, 1]} : vector<8x96xf32> to vector<8x32xf32>
    %57 = vector.extract_strided_slice %53 {offsets = [0, 32], sizes = [8, 32], strides = [1, 1]} : vector<8x96xf32> to vector<8x32xf32>
    %58 = vector.extract_strided_slice %53 {offsets = [0, 64], sizes = [8, 32], strides = [1, 1]} : vector<8x96xf32> to vector<8x32xf32>
    %59 = arith.mulf %57, %41 : vector<8x32xf32>
    %60 = arith.mulf %56, %55 : vector<8x32xf32>
    %61 = arith.addf %59, %60 : vector<8x32xf32>
    %62 = math.tanh %61 : vector<8x32xf32>
    %63 = arith.mulf %58, %62 : vector<8x32xf32>
    %64 = vector.broadcast %c1_i32 : i32 to vector<8x32xi32>
    %65 = arith.cmpi sgt, %13, %64 : vector<8x32xi32>
    %66 = arith.select %65, %63, %40 : vector<8x32xi1>, vector<8x32xf32>
    %67 = arith.select %65, %61, %41 : vector<8x32xi1>, vector<8x32xf32>
    %c2_i32 = arith.constant 2 : i32
    %68 = arith.index_cast %c2_i32 : i32 to index
    %c0_23 = arith.constant 0 : index
    %c0_24 = arith.constant 0 : index
    %69 = vector.load %arg7[%68, %c0_23, %c0_24] : memref<8x8x128xf32, #tpu.memory_space<vmem>>, vector<1x8x128xf32>
    %70 = vector.shape_cast %69 : vector<1x8x128xf32> to vector<8x128xf32>
    %71 = arith.truncf %66 : vector<8x32xf32> to vector<8x32xbf16>
    %cst_25 = arith.constant dense<0.000000e+00> : vector<8x128xf32>
    %72 = tpu.matmul %71, %10, %cst_25 {dimension_numbers = #tpu.dot_dimension_numbers<[1], [0], [0], [1], [0, 0, 1, 1], [], []>} : vector<8x32xbf16>, vector<32x128xbf16>, vector<8x128xf32> -> vector<8x128xf32>
    %73 = arith.addf %70, %72 : vector<8x128xf32>
    %74 = vector.extract_strided_slice %73 {offsets = [0, 0], sizes = [8, 96], strides = [1, 1]} : vector<8x128xf32> to vector<8x96xf32>
    %75 = arith.negf %74 : vector<8x96xf32>
    %76 = math.exp %75 : vector<8x96xf32>
    %cst_26 = arith.constant 1.000000e+00 : f32
    %77 = vector.broadcast %cst_26 : f32 to vector<8x96xf32>
    %78 = arith.addf %77, %76 : vector<8x96xf32>
    %79 = arith.divf %77, %78 : vector<8x96xf32>
    %80 = vector.extract_strided_slice %73 {offsets = [0, 96], sizes = [8, 32], strides = [1, 1]} : vector<8x128xf32> to vector<8x32xf32>
    %81 = math.tanh %80 : vector<8x32xf32>
    %82 = vector.extract_strided_slice %79 {offsets = [0, 0], sizes = [8, 32], strides = [1, 1]} : vector<8x96xf32> to vector<8x32xf32>
    %83 = vector.extract_strided_slice %79 {offsets = [0, 32], sizes = [8, 32], strides = [1, 1]} : vector<8x96xf32> to vector<8x32xf32>
    %84 = vector.extract_strided_slice %79 {offsets = [0, 64], sizes = [8, 32], strides = [1, 1]} : vector<8x96xf32> to vector<8x32xf32>
    %85 = arith.mulf %83, %67 : vector<8x32xf32>
    %86 = arith.mulf %82, %81 : vector<8x32xf32>
    %87 = arith.addf %85, %86 : vector<8x32xf32>
    %88 = math.tanh %87 : vector<8x32xf32>
    %89 = arith.mulf %84, %88 : vector<8x32xf32>
    %90 = vector.broadcast %c2_i32 : i32 to vector<8x32xi32>
    %91 = arith.cmpi sgt, %13, %90 : vector<8x32xi32>
    %92 = arith.select %91, %89, %66 : vector<8x32xi1>, vector<8x32xf32>
    %93 = arith.select %91, %87, %67 : vector<8x32xi1>, vector<8x32xf32>
    %c3_i32 = arith.constant 3 : i32
    %94 = arith.index_cast %c3_i32 : i32 to index
    %c0_27 = arith.constant 0 : index
    %c0_28 = arith.constant 0 : index
    %95 = vector.load %arg7[%94, %c0_27, %c0_28] : memref<8x8x128xf32, #tpu.memory_space<vmem>>, vector<1x8x128xf32>
    %96 = vector.shape_cast %95 : vector<1x8x128xf32> to vector<8x128xf32>
    %97 = arith.truncf %92 : vector<8x32xf32> to vector<8x32xbf16>
    %cst_29 = arith.constant dense<0.000000e+00> : vector<8x128xf32>
    %98 = tpu.matmul %97, %10, %cst_29 {dimension_numbers = #tpu.dot_dimension_numbers<[1], [0], [0], [1], [0, 0, 1, 1], [], []>} : vector<8x32xbf16>, vector<32x128xbf16>, vector<8x128xf32> -> vector<8x128xf32>
    %99 = arith.addf %96, %98 : vector<8x128xf32>
    %100 = vector.extract_strided_slice %99 {offsets = [0, 0], sizes = [8, 96], strides = [1, 1]} : vector<8x128xf32> to vector<8x96xf32>
    %101 = arith.negf %100 : vector<8x96xf32>
    %102 = math.exp %101 : vector<8x96xf32>
    %cst_30 = arith.constant 1.000000e+00 : f32
    %103 = vector.broadcast %cst_30 : f32 to vector<8x96xf32>
    %104 = arith.addf %103, %102 : vector<8x96xf32>
    %105 = arith.divf %103, %104 : vector<8x96xf32>
    %106 = vector.extract_strided_slice %99 {offsets = [0, 96], sizes = [8, 32], strides = [1, 1]} : vector<8x128xf32> to vector<8x32xf32>
    %107 = math.tanh %106 : vector<8x32xf32>
    %108 = vector.extract_strided_slice %105 {offsets = [0, 0], sizes = [8, 32], strides = [1, 1]} : vector<8x96xf32> to vector<8x32xf32>
    %109 = vector.extract_strided_slice %105 {offsets = [0, 32], sizes = [8, 32], strides = [1, 1]} : vector<8x96xf32> to vector<8x32xf32>
    %110 = vector.extract_strided_slice %105 {offsets = [0, 64], sizes = [8, 32], strides = [1, 1]} : vector<8x96xf32> to vector<8x32xf32>
    %111 = arith.mulf %109, %93 : vector<8x32xf32>
    %112 = arith.mulf %108, %107 : vector<8x32xf32>
    %113 = arith.addf %111, %112 : vector<8x32xf32>
    %114 = math.tanh %113 : vector<8x32xf32>
    %115 = arith.mulf %110, %114 : vector<8x32xf32>
    %116 = vector.broadcast %c3_i32 : i32 to vector<8x32xi32>
    %117 = arith.cmpi sgt, %13, %116 : vector<8x32xi32>
    %118 = arith.select %117, %115, %92 : vector<8x32xi1>, vector<8x32xf32>
    %119 = arith.select %117, %113, %93 : vector<8x32xi1>, vector<8x32xf32>
    %c4_i32 = arith.constant 4 : i32
    %120 = arith.index_cast %c4_i32 : i32 to index
    %c0_31 = arith.constant 0 : index
    %c0_32 = arith.constant 0 : index
    %121 = vector.load %arg7[%120, %c0_31, %c0_32] : memref<8x8x128xf32, #tpu.memory_space<vmem>>, vector<1x8x128xf32>
    %122 = vector.shape_cast %121 : vector<1x8x128xf32> to vector<8x128xf32>
    %123 = arith.truncf %118 : vector<8x32xf32> to vector<8x32xbf16>
    %cst_33 = arith.constant dense<0.000000e+00> : vector<8x128xf32>
    %124 = tpu.matmul %123, %10, %cst_33 {dimension_numbers = #tpu.dot_dimension_numbers<[1], [0], [0], [1], [0, 0, 1, 1], [], []>} : vector<8x32xbf16>, vector<32x128xbf16>, vector<8x128xf32> -> vector<8x128xf32>
    %125 = arith.addf %122, %124 : vector<8x128xf32>
    %126 = vector.extract_strided_slice %125 {offsets = [0, 0], sizes = [8, 96], strides = [1, 1]} : vector<8x128xf32> to vector<8x96xf32>
    %127 = arith.negf %126 : vector<8x96xf32>
    %128 = math.exp %127 : vector<8x96xf32>
    %cst_34 = arith.constant 1.000000e+00 : f32
    %129 = vector.broadcast %cst_34 : f32 to vector<8x96xf32>
    %130 = arith.addf %129, %128 : vector<8x96xf32>
    %131 = arith.divf %129, %130 : vector<8x96xf32>
    %132 = vector.extract_strided_slice %125 {offsets = [0, 96], sizes = [8, 32], strides = [1, 1]} : vector<8x128xf32> to vector<8x32xf32>
    %133 = math.tanh %132 : vector<8x32xf32>
    %134 = vector.extract_strided_slice %131 {offsets = [0, 0], sizes = [8, 32], strides = [1, 1]} : vector<8x96xf32> to vector<8x32xf32>
    %135 = vector.extract_strided_slice %131 {offsets = [0, 32], sizes = [8, 32], strides = [1, 1]} : vector<8x96xf32> to vector<8x32xf32>
    %136 = vector.extract_strided_slice %131 {offsets = [0, 64], sizes = [8, 32], strides = [1, 1]} : vector<8x96xf32> to vector<8x32xf32>
    %137 = arith.mulf %135, %119 : vector<8x32xf32>
    %138 = arith.mulf %134, %133 : vector<8x32xf32>
    %139 = arith.addf %137, %138 : vector<8x32xf32>
    %140 = math.tanh %139 : vector<8x32xf32>
    %141 = arith.mulf %136, %140 : vector<8x32xf32>
    %142 = vector.broadcast %c4_i32 : i32 to vector<8x32xi32>
    %143 = arith.cmpi sgt, %13, %142 : vector<8x32xi32>
    %144 = arith.select %143, %141, %118 : vector<8x32xi1>, vector<8x32xf32>
    %145 = arith.select %143, %139, %119 : vector<8x32xi1>, vector<8x32xf32>
    %c5_i32 = arith.constant 5 : i32
    %146 = arith.index_cast %c5_i32 : i32 to index
    %c0_35 = arith.constant 0 : index
    %c0_36 = arith.constant 0 : index
    %147 = vector.load %arg7[%146, %c0_35, %c0_36] : memref<8x8x128xf32, #tpu.memory_space<vmem>>, vector<1x8x128xf32>
    %148 = vector.shape_cast %147 : vector<1x8x128xf32> to vector<8x128xf32>
    %149 = arith.truncf %144 : vector<8x32xf32> to vector<8x32xbf16>
    %cst_37 = arith.constant dense<0.000000e+00> : vector<8x128xf32>
    %150 = tpu.matmul %149, %10, %cst_37 {dimension_numbers = #tpu.dot_dimension_numbers<[1], [0], [0], [1], [0, 0, 1, 1], [], []>} : vector<8x32xbf16>, vector<32x128xbf16>, vector<8x128xf32> -> vector<8x128xf32>
    %151 = arith.addf %148, %150 : vector<8x128xf32>
    %152 = vector.extract_strided_slice %151 {offsets = [0, 0], sizes = [8, 96], strides = [1, 1]} : vector<8x128xf32> to vector<8x96xf32>
    %153 = arith.negf %152 : vector<8x96xf32>
    %154 = math.exp %153 : vector<8x96xf32>
    %cst_38 = arith.constant 1.000000e+00 : f32
    %155 = vector.broadcast %cst_38 : f32 to vector<8x96xf32>
    %156 = arith.addf %155, %154 : vector<8x96xf32>
    %157 = arith.divf %155, %156 : vector<8x96xf32>
    %158 = vector.extract_strided_slice %151 {offsets = [0, 96], sizes = [8, 32], strides = [1, 1]} : vector<8x128xf32> to vector<8x32xf32>
    %159 = math.tanh %158 : vector<8x32xf32>
    %160 = vector.extract_strided_slice %157 {offsets = [0, 0], sizes = [8, 32], strides = [1, 1]} : vector<8x96xf32> to vector<8x32xf32>
    %161 = vector.extract_strided_slice %157 {offsets = [0, 32], sizes = [8, 32], strides = [1, 1]} : vector<8x96xf32> to vector<8x32xf32>
    %162 = vector.extract_strided_slice %157 {offsets = [0, 64], sizes = [8, 32], strides = [1, 1]} : vector<8x96xf32> to vector<8x32xf32>
    %163 = arith.mulf %161, %145 : vector<8x32xf32>
    %164 = arith.mulf %160, %159 : vector<8x32xf32>
    %165 = arith.addf %163, %164 : vector<8x32xf32>
    %166 = math.tanh %165 : vector<8x32xf32>
    %167 = arith.mulf %162, %166 : vector<8x32xf32>
    %168 = vector.broadcast %c5_i32 : i32 to vector<8x32xi32>
    %169 = arith.cmpi sgt, %13, %168 : vector<8x32xi32>
    %170 = arith.select %169, %167, %144 : vector<8x32xi1>, vector<8x32xf32>
    %171 = arith.select %169, %165, %145 : vector<8x32xi1>, vector<8x32xf32>
    %c6_i32 = arith.constant 6 : i32
    %172 = arith.index_cast %c6_i32 : i32 to index
    %c0_39 = arith.constant 0 : index
    %c0_40 = arith.constant 0 : index
    %173 = vector.load %arg7[%172, %c0_39, %c0_40] : memref<8x8x128xf32, #tpu.memory_space<vmem>>, vector<1x8x128xf32>
    %174 = vector.shape_cast %173 : vector<1x8x128xf32> to vector<8x128xf32>
    %175 = arith.truncf %170 : vector<8x32xf32> to vector<8x32xbf16>
    %cst_41 = arith.constant dense<0.000000e+00> : vector<8x128xf32>
    %176 = tpu.matmul %175, %10, %cst_41 {dimension_numbers = #tpu.dot_dimension_numbers<[1], [0], [0], [1], [0, 0, 1, 1], [], []>} : vector<8x32xbf16>, vector<32x128xbf16>, vector<8x128xf32> -> vector<8x128xf32>
    %177 = arith.addf %174, %176 : vector<8x128xf32>
    %178 = vector.extract_strided_slice %177 {offsets = [0, 0], sizes = [8, 96], strides = [1, 1]} : vector<8x128xf32> to vector<8x96xf32>
    %179 = arith.negf %178 : vector<8x96xf32>
    %180 = math.exp %179 : vector<8x96xf32>
    %cst_42 = arith.constant 1.000000e+00 : f32
    %181 = vector.broadcast %cst_42 : f32 to vector<8x96xf32>
    %182 = arith.addf %181, %180 : vector<8x96xf32>
    %183 = arith.divf %181, %182 : vector<8x96xf32>
    %184 = vector.extract_strided_slice %177 {offsets = [0, 96], sizes = [8, 32], strides = [1, 1]} : vector<8x128xf32> to vector<8x32xf32>
    %185 = math.tanh %184 : vector<8x32xf32>
    %186 = vector.extract_strided_slice %183 {offsets = [0, 0], sizes = [8, 32], strides = [1, 1]} : vector<8x96xf32> to vector<8x32xf32>
    %187 = vector.extract_strided_slice %183 {offsets = [0, 32], sizes = [8, 32], strides = [1, 1]} : vector<8x96xf32> to vector<8x32xf32>
    %188 = vector.extract_strided_slice %183 {offsets = [0, 64], sizes = [8, 32], strides = [1, 1]} : vector<8x96xf32> to vector<8x32xf32>
    %189 = arith.mulf %187, %171 : vector<8x32xf32>
    %190 = arith.mulf %186, %185 : vector<8x32xf32>
    %191 = arith.addf %189, %190 : vector<8x32xf32>
    %192 = math.tanh %191 : vector<8x32xf32>
    %193 = arith.mulf %188, %192 : vector<8x32xf32>
    %194 = vector.broadcast %c6_i32 : i32 to vector<8x32xi32>
    %195 = arith.cmpi sgt, %13, %194 : vector<8x32xi32>
    %196 = arith.select %195, %193, %170 : vector<8x32xi1>, vector<8x32xf32>
    %197 = arith.select %195, %191, %171 : vector<8x32xi1>, vector<8x32xf32>
    %c7_i32 = arith.constant 7 : i32
    %198 = arith.index_cast %c7_i32 : i32 to index
    %c0_43 = arith.constant 0 : index
    %c0_44 = arith.constant 0 : index
    %199 = vector.load %arg7[%198, %c0_43, %c0_44] : memref<8x8x128xf32, #tpu.memory_space<vmem>>, vector<1x8x128xf32>
    %200 = vector.shape_cast %199 : vector<1x8x128xf32> to vector<8x128xf32>
    %201 = arith.truncf %196 : vector<8x32xf32> to vector<8x32xbf16>
    %cst_45 = arith.constant dense<0.000000e+00> : vector<8x128xf32>
    %202 = tpu.matmul %201, %10, %cst_45 {dimension_numbers = #tpu.dot_dimension_numbers<[1], [0], [0], [1], [0, 0, 1, 1], [], []>} : vector<8x32xbf16>, vector<32x128xbf16>, vector<8x128xf32> -> vector<8x128xf32>
    %203 = arith.addf %200, %202 : vector<8x128xf32>
    %204 = vector.extract_strided_slice %203 {offsets = [0, 0], sizes = [8, 96], strides = [1, 1]} : vector<8x128xf32> to vector<8x96xf32>
    %205 = arith.negf %204 : vector<8x96xf32>
    %206 = math.exp %205 : vector<8x96xf32>
    %cst_46 = arith.constant 1.000000e+00 : f32
    %207 = vector.broadcast %cst_46 : f32 to vector<8x96xf32>
    %208 = arith.addf %207, %206 : vector<8x96xf32>
    %209 = arith.divf %207, %208 : vector<8x96xf32>
    %210 = vector.extract_strided_slice %203 {offsets = [0, 96], sizes = [8, 32], strides = [1, 1]} : vector<8x128xf32> to vector<8x32xf32>
    %211 = math.tanh %210 : vector<8x32xf32>
    %212 = vector.extract_strided_slice %209 {offsets = [0, 0], sizes = [8, 32], strides = [1, 1]} : vector<8x96xf32> to vector<8x32xf32>
    %213 = vector.extract_strided_slice %209 {offsets = [0, 32], sizes = [8, 32], strides = [1, 1]} : vector<8x96xf32> to vector<8x32xf32>
    %214 = vector.extract_strided_slice %209 {offsets = [0, 64], sizes = [8, 32], strides = [1, 1]} : vector<8x96xf32> to vector<8x32xf32>
    %215 = arith.mulf %213, %197 : vector<8x32xf32>
    %216 = arith.mulf %212, %211 : vector<8x32xf32>
    %217 = arith.addf %215, %216 : vector<8x32xf32>
    %218 = math.tanh %217 : vector<8x32xf32>
    %219 = arith.mulf %214, %218 : vector<8x32xf32>
    %220 = vector.broadcast %c7_i32 : i32 to vector<8x32xi32>
    %221 = arith.cmpi sgt, %13, %220 : vector<8x32xi32>
    %222 = arith.select %221, %219, %196 : vector<8x32xi1>, vector<8x32xf32>
    %223 = arith.select %221, %217, %197 : vector<8x32xi1>, vector<8x32xf32>
    %c8_i32 = arith.constant 8 : i32
    %c0_47 = arith.constant 0 : index
    %c0_48 = arith.constant 0 : index
    %224 = vector.load %arg6[%c0_47, %c0_48] : memref<8x32xf32, #tpu.memory_space<vmem>>, vector<8x32xf32>
    tpu.vector_store %arg6[%c0_47, %c0_48], %222 {strides = array<i32>} : memref<8x32xf32, #tpu.memory_space<vmem>>, vector<8x32xf32>,
    return
  }
  func.func @transform_0(%arg0: i32) -> (i32, i32, i32) {
    %c0_i32 = arith.constant 0 : i32
    %c0_i32_0 = arith.constant 0 : i32
    %c0_i32_1 = arith.constant 0 : i32
    return %c0_i32, %arg0, %c0_i32_0 : i32, i32, i32
  }
  func.func @transform_1(%arg0: i32) -> (i32, i32) {
    %c0_i32 = arith.constant 0 : i32
    %c0_i32_0 = arith.constant 0 : i32
    return %arg0, %c0_i32 : i32, i32
  }
  func.func @transform_2(%arg0: i32) -> (i32, i32) {
    %c0_i32 = arith.constant 0 : i32
    %c0_i32_0 = arith.constant 0 : i32
    %c0_i32_1 = arith.constant 0 : i32
    return %c0_i32, %c0_i32_0 : i32, i32
  }
  func.func @transform_3(%arg0: i32) -> (i32, i32) {
    %c0_i32 = arith.constant 0 : i32
    %c0_i32_0 = arith.constant 0 : i32
    %c0_i32_1 = arith.constant 0 : i32
    return %c0_i32, %c0_i32_0 : i32, i32
  }
  func.func @transform_4(%arg0: i32) -> (i32, i32) {
    %c0_i32 = arith.constant 0 : i32
    %c0_i32_0 = arith.constant 0 : i32
    %c0_i32_1 = arith.constant 0 : i32
    return %c0_i32, %c0_i32_0 : i32, i32
  }
  func.func @transform_5(%arg0: i32) -> (i32, i32) {
    %c0_i32 = arith.constant 0 : i32
    %c0_i32_0 = arith.constant 0 : i32
    return %arg0, %c0_i32 : i32, i32
  }
}

</mosaic_0001>

<bundles_post_ra>
// kernel: tpu_custom_call.1
= control target key start
LH: loop header
LB: loop body
LE: loop exit
PB: predicated region body
PF: predicated region fallthrough
CT: control target
= control target key end

     0   :  { %10 = vsyncpa [#allocation4], 0  ;;  %s1021_s0 = inlined_call_operand.hbm [shape: f32[8,8,8], index: 0, kind: input, shape index: {}]   ;;  %s1022_s1 = inlined_call_operand.vmem [shape: s32[8,1], index: 1, kind: input, shape index: {}]   ;;  %s1023_s2 = inlined_call_operand.vmem [shape: bf16[8,128], index: 2, kind: input, shape index: {}]   ;;  %s1024_s3 = inlined_call_operand.vmem [shape: f32[1,128], index: 3, kind: input, shape index: {}]   ;;  %s1025_s4 = inlined_call_operand.hbm [shape: bf16[32,128], index: 4, kind: input, shape index: {}]   ;;  %s1026_s5 = inlined_call_operand.hbm [shape: f32[8,32], index: 5, kind: output, shape index: {}]  }
   0x1   :  { %11 = vsyncpa [#allocation7], 0 }
   0x2   :  { %12 = vsyncpa [#allocation5], 0  ;;  %s17_s20 = sshll.u32 %s1021_s0, 4  ;;  %s850_s21 = smov [#allocation3]   ;;  %s18_s20 = int_to_ptr.hbm [resolvable:$true] %s17_s20 }
   0x3   :  { %s19_s22 = sshll.u32 %s850_s21, 4  ;;  %s36_s25 = sshll.u32 %s1025_s4, 4  ;;  %s20_s22 = int_to_ptr.vmem [resolvable:$true] %s19_s22  ;;  %s37_s25 = int_to_ptr.hbm [resolvable:$true] %s36_s25 }
   0x4   :  { %s851_s26 = smov 128   ;;  %s852_s27 = smov 8  }
   0x5   :  { %25 = dma.hbm_to_vmem [thread:$0]  %s18_s20, 1024, %s20_s22, [#allocation4], %s851_s26, %s851_s26, %s852_s27  }
   0x6   :  { %s853_s28 = smov [#allocation6]   ;;  %s854_s30 = smov 64  }
   0x7   :  { %s38_s29 = sshll.u32 %s853_s28, 4  ;;  %s855_s6 = smov 4   ;;  %s39_s29 = int_to_ptr.vmem [resolvable:$true] %s38_s29 }
   0x8   :  { %44 = dma.hbm_to_vmem [thread:$0]  %s37_s25, 256, %s39_s29, [#allocation7], %s854_s30, %s854_s30, %s855_s6  }
   0x9   :  { %844 = dma.done.wait [#allocation4], 1024  }
   0xa   :  { %845 = vsyncadd [#allocation4], 4294966272 }
   0xb   :  { %846 = dma.done.wait [#allocation7], 256  }
   0xc   :  { %847 = vsyncadd [#allocation7], 4294967040  ;;  %v856_v0 = vmov 0   ;;  %vm84_vm0 = vcmask 1043456   ;;  %v66_v1 = vld [vmem:[%s1023_s2] sm:$0xf] }
   0xd   :  { %705 = vset.pattern.permute.xlu1 %v856_v0  ;;  %706 = vset.pattern.permute.xlu0 %v856_v0  ;;  %v900_v2 = vld [vmem:[#allocation6 + $0x8] sm:$0xff]  ;;  %v54_v3 = vld [vmem:[#allocation3] sm:$0xff]  ;;  %v86_v4 = vsel %vm84_vm0, %v66_v1, 0  ;;  %vm71_vm1 = vcmask 64512   ;;  %s857_s8 = smov 32   ;;  %vm146_vm7 = vcmask 261120  }
   0xe   :  { %v55_v5 = vld [vmem:[#allocation3 + $0x8] sm:$0xff]  ;;  %95 = vmatpush.bf16.msra.mxu0 %v86_v4  ;;  %156 = vmatpush.bf16.msra.mxu1 %v900_v2  ;;  %v903_v7 = vld [vmem:[#allocation6] sm:$0xff]  ;;  %v57_v4 = vld [vmem:[#allocation3 + $0x18] sm:$0xff]  ;;  %s656_s13 = sshll.u32 %s1026_s5, 4  ;;  %s657_s13 = int_to_ptr.hbm [resolvable:$true] %s656_s13 }
   0xf   :  { %v62_v6 = vpack.c.bf16 %v55_v5, %v54_v3  ;;  %219 = vmatpush.bf16.msra.mxu2 %v900_v2  ;;  %282 = vmatpush.bf16.msra.mxu3 %v900_v2  ;;  %v922_v8 = vld [vmem:[%s1024_s3] ss:$0 sm:$0xff]  ;;  %v56_v3 = vld [vmem:[#allocation3 + $0x10] sm:$0xff] }
  0x10   :  { %v129_v34 = vld [vmem:[%s1022_s1] sm:$0xff]  ;;  %v63_v5 = vpack.c.bf16 %v57_v4, %v56_v3  ;;  %s858_s1 = smov [#allocation8]  }
  0x11   :  { %667 = vmatmul.msk.bf16.vlgmr.msra.gmra.mxu0 %vm71_vm1, %v62_v6  ;;  %s654_s10 = sshll.u32 %s858_s1, 4  ;;  %s655_s10 = int_to_ptr.vmem [resolvable:$true] %s654_s10 }
  0x12   :  { %157 = vmatpush.bf16.msra.mxu1 %v903_v7 }
  0x13   :  { %220 = vmatpush.bf16.msra.mxu2 %v903_v7  ;;  %283 = vmatpush.bf16.msra.mxu3 %v903_v7 }
  0x15   :  { %158 = vmatmul.bf16.vlgmr.msra.gmra.mxu1 %v856_v0 }
  0x16   :  { %345 = vmatpush.bf16.msrb.mxu1 %v900_v2 }
  0x17   :  { %408 = vmatpush.bf16.msrb.mxu2 %v900_v2  ;;  %471 = vmatpush.bf16.msrb.mxu3 %v900_v2 }
  0x1a   :  { %346 = vmatpush.bf16.msrb.mxu1 %v903_v7 }
  0x1b   :  { %409 = vmatpush.bf16.msrb.mxu2 %v903_v7  ;;  %472 = vmatpush.bf16.msrb.mxu3 %v903_v7 }
  0x1e   :  { %534 = vmatpush.bf16.msra.mxu1 %v900_v2 }
  0x21   :  { %668 = vmatmul.msk.bf16.gmra.mxu0 %vm71_vm1, %v63_v5 }
  0x22   :  { %535 = vmatpush.bf16.msra.mxu1 %v903_v7 }
  0x8e   :  { %v97_v9 = vpop.f32.mrf.mxu0 }
  0x8f   :  { %v98_v10 = vadd.f32 %v922_v8, %v97_v9 }
  0x92   :  { %v159_v11 = vpop.f32.mrf.mxu1 }
  0x93   :  { %v163_v12 = vadd.f32 %v159_v11, %v98_v10 }
  0x95   :  { %708 = vtanh.f32 %v163_v12  ;;  %v679_v15 = vmul.f32 -1.442695, %v163_v12 }
  0x96   :  { %v99_v41 = vpop.f32.mrf.mxu0 }
  0x97   :  { %710 = vpow2.f32 %v679_v15  ;;  %v100_v42 = vadd.f32 %v922_v8, %v99_v41 }
  0x9a   :  { %v161_v13 = vpop.f32.mrf.mxu1 }
  0x9b   :  { %v709_v14 = vpop.eup %708 }
  0x9c   :  { %186 = vrot.lane.b32.xlu0 %v709_v14, %s857_s8 }
  0x9d   :  { %v711_v16 = vpop.eup %710 }
  0x9e   :  { %v167_v17 = vadd.f32 1.0, %v711_v16  ;;  %v102_v12 = vpop.f32.mrf.mxu0 }
  0x9f   :  { %v103_v13 = vadd.f32 %v922_v8, %v102_v12 }
  0xa0   :  { %712 = vrcp.f32 %v167_v17  ;;  %v179_v23 = vand.u32 2147483648, %v167_v17  ;;  %vm173_vm3 = vweird.f32 %v167_v17  ;;  %v177_v24 = vand.u32 2147483647, %v167_v17 }
  0xa2   :  { %v180_v26 = vor.u32 1.1754944e-38, %v179_v23  ;;  %vm178_vm5 = vcmp.eq.f32.partialorder %v177_v24, 8.507059e+37 }
  0xa6   :  { %v713_v18 = vpop.eup %712 }
  0xa7   :  { %v169_v19 = vmul.f32 %v713_v18, %v167_v17  ;;  %vm174_vm2 = vweird.f32 %v713_v18 }
  0xa8   :  { %vm175_vm4 = vmor %vm173_vm3, %vm174_vm2 }
  0xa9   :  { %v170_v20 = vsub.f32 1.0, %v169_v19 }
  0xab   :  { %v171_v21 = vmul.f32 %v713_v18, %v170_v20 }
  0xad   :  { %v172_v22 = vadd.f32 %v713_v18, %v171_v21 }
  0xaf   :  { %v176_v25 = vsel %vm175_vm4, %v713_v18, %v172_v22 }
  0xb0   :  { %v181_v28 = vsel %vm178_vm5, %v180_v26, %v176_v25 }
  0xb1   :  { %v184_v30 = vmul.f32 0.0, %v181_v28 }
 0x10e   :  { %v187_v27 = vpop.permute.xlu0 %186 }
 0x10f   :  { %v189_v29 = vmul.f32 %v187_v27, %v181_v28 }
 0x111   :  { %191 = vrot.lane.b32.xlu0 %v189_v29, %s857_s8 }
 0x183   :  { %v192_v31 = vpop.permute.xlu0 %191 }
 0x184   :  { %v194_v32 = vadd.f32 %v192_v31, %v184_v30 }
 0x186   :  { %714 = vtanh.f32 %v194_v32 }
 0x18c   :  { %v715_v33 = vpop.eup %714 }
 0x18d   :  { %197 = vrot.lane.b32.xlu1 %v715_v33, %s857_s8 }
 0x195   :  { %131 = vperm.xlu1 %705, %v129_v34  }
 0x1ff   :  { %v198_v35 = vpop.permute.xlu1 %197 }
 0x200   :  { %v200_v36 = vmul.f32 %v198_v35, %v181_v28 }
 0x207   :  { %v931_v37 = vpop.permute.xlu1 %131 }
 0x208   :  { %vm201_vm6 = vcmp.gt.s32.totalorder %v931_v37, 0  ;;  %vm264_vm12 = vcmp.gt.s32.totalorder %v931_v37, 1  ;;  %vm327_vm2 = vcmp.gt.s32.totalorder %v931_v37, 2 }
 0x209   :  { %v202_v38 = vsel %vm201_vm6, %v200_v36, 0.0  ;;  %v203_v62 = vsel %vm201_vm6, %v194_v32, 0.0 }
 0x20a   :  { %v206_v39 = vpack.c.bf16 %v202_v38, %v202_v38 }
 0x20c   :  { %208 = vrot.lane.b32.xlu2 %v206_v39, %s854_s30 }
 0x266   :  { %v209_v40 = vpop.permute.xlu2 %208 }
 0x267   :  { %680 = vmatmul.msk.bf16.vlgmr.msra.gmra.mxu2 %vm146_vm7, %v209_v40 }
 0x268   :  { %597 = vmatpush.bf16.msra.mxu2 %v900_v2 }
 0x26c   :  { %598 = vmatpush.bf16.msra.mxu2 %v903_v7 }
 0x2ea   :  { %v222_v43 = vpop.f32.mrf.mxu2 }
 0x2eb   :  { %v226_v44 = vadd.f32 %v222_v43, %v100_v42 }
 0x2ed   :  { %716 = vtanh.f32 %v226_v44  ;;  %v681_v47 = vmul.f32 -1.442695, %v226_v44  ;;  %v104_v44 = vpop.f32.mrf.mxu0 }
 0x2ef   :  { %718 = vpow2.f32 %v681_v47 }
 0x2f2   :  { %v224_v45 = vpop.f32.mrf.mxu2 }
 0x2f3   :  { %v717_v46 = vpop.eup %716  ;;  %v105_v45 = vadd.f32 %v922_v8, %v104_v44 }
 0x2f4   :  { %249 = vrot.lane.b32.xlu2 %v717_v46, %s857_s8 }
 0x2f5   :  { %v719_v48 = vpop.eup %718 }
 0x2f6   :  { %v230_v49 = vadd.f32 1.0, %v719_v48 }
 0x2f8   :  { %720 = vrcp.f32 %v230_v49  ;;  %v242_v55 = vand.u32 2147483648, %v230_v49  ;;  %vm236_vm9 = vweird.f32 %v230_v49  ;;  %v240_v56 = vand.u32 2147483647, %v230_v49 }
 0x2fa   :  { %v243_v58 = vor.u32 1.1754944e-38, %v242_v55  ;;  %vm241_vm11 = vcmp.eq.f32.partialorder %v240_v56, 8.507059e+37 }
 0x2fe   :  { %v721_v50 = vpop.eup %720 }
 0x2ff   :  { %v232_v51 = vmul.f32 %v721_v50, %v230_v49  ;;  %vm237_vm8 = vweird.f32 %v721_v50 }
 0x300   :  { %vm238_vm10 = vmor %vm236_vm9, %vm237_vm8  ;;  %vm390_vm8 = vcmp.gt.s32.totalorder %v931_v37, 3 }
 0x301   :  { %v233_v52 = vsub.f32 1.0, %v232_v51 }
 0x303   :  { %v234_v53 = vmul.f32 %v721_v50, %v233_v52 }
 0x305   :  { %v235_v54 = vadd.f32 %v721_v50, %v234_v53 }
 0x307   :  { %v239_v57 = vsel %vm238_vm10, %v721_v50, %v235_v54 }
 0x308   :  { %v244_v60 = vsel %vm241_vm11, %v243_v58, %v239_v57 }
 0x309   :  { %v247_v63 = vmul.f32 %v244_v60, %v203_v62 }
 0x34e   :  { %v250_v59 = vpop.permute.xlu2 %249 }
 0x34f   :  { %v252_v61 = vmul.f32 %v250_v59, %v244_v60 }
 0x351   :  { %254 = vrot.lane.b32.xlu0 %v252_v61, %s857_s8 }
 0x3c3   :  { %v255_v0 = vpop.permute.xlu0 %254 }
 0x3c4   :  { %v257_v1 = vadd.f32 %v255_v0, %v247_v63 }
 0x3c6   :  { %722 = vtanh.f32 %v257_v1  ;;  %v266_v33 = vsel %vm264_vm12, %v257_v1, %v203_v62 }
 0x3cc   :  { %v723_v2 = vpop.eup %722 }
 0x3cd   :  { %260 = vrot.lane.b32.xlu1 %v723_v2, %s857_s8 }
 0x43f   :  { %v261_v6 = vpop.permute.xlu1 %260 }
 0x440   :  { %v263_v7 = vmul.f32 %v261_v6, %v244_v60  ;;  %v58_v6 = vld [vmem:[#allocation3 + $0x20] sm:$0xff] }
 0x442   :  { %v265_v9 = vsel %vm264_vm12, %v263_v7, %v202_v38  ;;  %v59_v7 = vld [vmem:[#allocation3 + $0x28] sm:$0xff] }
 0x443   :  { %v269_v10 = vpack.c.bf16 %v265_v9, %v265_v9 }
 0x445   :  { %271 = vrot.lane.b32.xlu2 %v269_v10, %s854_s30 }
 0x49f   :  { %v272_v11 = vpop.permute.xlu2 %271 }
 0x4a0   :  { %682 = vmatmul.msk.bf16.vlgmr.msra.gmra.mxu3 %vm146_vm7, %v272_v11 }
 0x523   :  { %v285_v14 = vpop.f32.mrf.mxu3 }
 0x524   :  { %v289_v15 = vadd.f32 %v285_v14, %v103_v13 }
 0x526   :  { %724 = vtanh.f32 %v289_v15  ;;  %v683_v18 = vmul.f32 -1.442695, %v289_v15 }
 0x528   :  { %726 = vpow2.f32 %v683_v18 }
 0x52b   :  { %v287_v16 = vpop.f32.mrf.mxu3 }
 0x52c   :  { %v725_v17 = vpop.eup %724 }
 0x52d   :  { %312 = vrot.lane.b32.xlu0 %v725_v17, %s857_s8 }
 0x52e   :  { %v727_v19 = vpop.eup %726 }
 0x52f   :  { %v293_v20 = vadd.f32 1.0, %v727_v19 }
 0x531   :  { %728 = vrcp.f32 %v293_v20  ;;  %v305_v26 = vand.u32 2147483648, %v293_v20  ;;  %vm299_vm14 = vweird.f32 %v293_v20  ;;  %v303_v27 = vand.u32 2147483647, %v293_v20 }
 0x533   :  { %v306_v29 = vor.u32 1.1754944e-38, %v305_v26  ;;  %vm304_vm0 = vcmp.eq.f32.partialorder %v303_v27, 8.507059e+37 }
 0x537   :  { %v729_v21 = vpop.eup %728 }
 0x538   :  { %v295_v22 = vmul.f32 %v729_v21, %v293_v20  ;;  %vm300_vm13 = vweird.f32 %v729_v21 }
 0x539   :  { %vm301_vm15 = vmor %vm299_vm14, %vm300_vm13  ;;  %vm453_vm13 = vcmp.gt.s32.totalorder %v931_v37, 4 }
 0x53a   :  { %v296_v23 = vsub.f32 1.0, %v295_v22 }
 0x53c   :  { %v297_v24 = vmul.f32 %v729_v21, %v296_v23 }
 0x53e   :  { %v298_v25 = vadd.f32 %v729_v21, %v297_v24 }
 0x540   :  { %v302_v28 = vsel %vm301_vm15, %v729_v21, %v298_v25 }
 0x541   :  { %v307_v31 = vsel %vm304_vm0, %v306_v29, %v302_v28 }
 0x542   :  { %v310_v34 = vmul.f32 %v307_v31, %v266_v33 }
 0x59f   :  { %v313_v30 = vpop.permute.xlu0 %312 }
 0x5a0   :  { %v315_v32 = vmul.f32 %v313_v30, %v307_v31 }
 0x5a2   :  { %317 = vrot.lane.b32.xlu1 %v315_v32, %s857_s8 }
 0x614   :  { %v318_v35 = vpop.permute.xlu1 %317 }
 0x615   :  { %v320_v36 = vadd.f32 %v318_v35, %v310_v34 }
 0x617   :  { %730 = vtanh.f32 %v320_v36  ;;  %v329_v1 = vsel %vm327_vm2, %v320_v36, %v266_v33 }
 0x61d   :  { %v731_v38 = vpop.eup %730 }
 0x61e   :  { %323 = vrot.lane.b32.xlu2 %v731_v38, %s857_s8 }
 0x678   :  { %v324_v39 = vpop.permute.xlu2 %323 }
 0x679   :  { %v326_v40 = vmul.f32 %v324_v39, %v307_v31 }
 0x67b   :  { %v328_v41 = vsel %vm327_vm2, %v326_v40, %v265_v9  ;;  %v64_v9 = vpack.c.bf16 %v59_v7, %v58_v6 }
 0x67c   :  { %v332_v42 = vpack.c.bf16 %v328_v41, %v328_v41 }
 0x67d   :  { %669 = vmatmul.msk.bf16.gmra.mxu0 %vm71_vm1, %v64_v9 }
 0x67e   :  { %334 = vrot.lane.b32.xlu0 %v332_v42, %s854_s30 }
 0x6f0   :  { %v335_v43 = vpop.permute.xlu0 %334 }
 0x6f1   :  { %684 = vmatmul.msk.bf16.vlgmr.msrb.gmra.mxu1 %vm146_vm7, %v335_v43 }
 0x6fa   :  { %v107_v15 = vpop.f32.mrf.mxu0 }
 0x6fb   :  { %v108_v16 = vadd.f32 %v922_v8, %v107_v15 }
 0x76e   :  { %v348_v46 = vpop.f32.mrf.mxu1 }
 0x76f   :  { %v352_v47 = vadd.f32 %v348_v46, %v105_v45 }
 0x771   :  { %732 = vtanh.f32 %v352_v47  ;;  %v685_v50 = vmul.f32 -1.442695, %v352_v47  ;;  %v109_v47 = vpop.f32.mrf.mxu0 }
 0x773   :  { %734 = vpow2.f32 %v685_v50 }
 0x776   :  { %v350_v48 = vpop.f32.mrf.mxu1 }
 0x777   :  { %v733_v49 = vpop.eup %732  ;;  %v110_v48 = vadd.f32 %v922_v8, %v109_v47 }
 0x778   :  { %375 = vrot.lane.b32.xlu1 %v733_v49, %s857_s8 }
 0x779   :  { %v735_v51 = vpop.eup %734 }
 0x77a   :  { %v356_v52 = vadd.f32 1.0, %v735_v51 }
 0x77c   :  { %736 = vrcp.f32 %v356_v52  ;;  %v368_v58 = vand.u32 2147483648, %v356_v52  ;;  %vm362_vm4 = vweird.f32 %v356_v52  ;;  %v366_v59 = vand.u32 2147483647, %v356_v52 }
 0x77e   :  { %v369_v61 = vor.u32 1.1754944e-38, %v368_v58  ;;  %vm367_vm6 = vcmp.eq.f32.partialorder %v366_v59, 8.507059e+37 }
 0x782   :  { %v737_v53 = vpop.eup %736 }
 0x783   :  { %v358_v54 = vmul.f32 %v737_v53, %v356_v52  ;;  %vm363_vm3 = vweird.f32 %v737_v53 }
 0x784   :  { %vm364_vm5 = vmor %vm362_vm4, %vm363_vm3  ;;  %vm516_vm3 = vcmp.gt.s32.totalorder %v931_v37, 5 }
 0x785   :  { %v359_v55 = vsub.f32 1.0, %v358_v54 }
 0x787   :  { %v360_v56 = vmul.f32 %v737_v53, %v359_v55 }
 0x789   :  { %v361_v57 = vadd.f32 %v737_v53, %v360_v56 }
 0x78b   :  { %v365_v60 = vsel %vm364_vm5, %v737_v53, %v361_v57 }
 0x78c   :  { %v370_v63 = vsel %vm367_vm6, %v369_v61, %v365_v60 }
 0x78d   :  { %v373_v2 = vmul.f32 %v370_v63, %v329_v1 }
 0x7ea   :  { %v376_v62 = vpop.permute.xlu1 %375 }
 0x7eb   :  { %v378_v0 = vmul.f32 %v376_v62, %v370_v63 }
 0x7ed   :  { %380 = vrot.lane.b32.xlu2 %v378_v0, %s857_s8 }
 0x847   :  { %v381_v3 = vpop.permute.xlu2 %380 }
 0x848   :  { %v383_v4 = vadd.f32 %v381_v3, %v373_v2 }
 0x84a   :  { %738 = vtanh.f32 %v383_v4  ;;  %v392_v36 = vsel %vm390_vm8, %v383_v4, %v329_v1 }
 0x850   :  { %v739_v5 = vpop.eup %738 }
 0x851   :  { %386 = vrot.lane.b32.xlu0 %v739_v5, %s857_s8 }
 0x8c3   :  { %v387_v10 = vpop.permute.xlu0 %386 }
 0x8c4   :  { %v389_v11 = vmul.f32 %v387_v10, %v370_v63  ;;  %v60_v10 = vld [vmem:[#allocation3 + $0x30] sm:$0xff] }
 0x8c6   :  { %v391_v12 = vsel %vm390_vm8, %v389_v11, %v328_v41  ;;  %v61_v11 = vld [vmem:[#allocation3 + $0x38] sm:$0xff]  ;;  %vm579_vm8 = vcmp.gt.s32.totalorder %v931_v37, 6 }
 0x8c7   :  { %v395_v13 = vpack.c.bf16 %v391_v12, %v391_v12 }
 0x8c9   :  { %397 = vrot.lane.b32.xlu1 %v395_v13, %s854_s30 }
 0x93b   :  { %v398_v14 = vpop.permute.xlu1 %397 }
 0x93c   :  { %686 = vmatmul.msk.bf16.vlgmr.msrb.gmra.mxu2 %vm146_vm7, %v398_v14 }
 0x9bf   :  { %v411_v17 = vpop.f32.mrf.mxu2 }
 0x9c0   :  { %v415_v18 = vadd.f32 %v411_v17, %v108_v16 }
 0x9c2   :  { %740 = vtanh.f32 %v415_v18  ;;  %v687_v21 = vmul.f32 -1.442695, %v415_v18 }
 0x9c4   :  { %742 = vpow2.f32 %v687_v21 }
 0x9c7   :  { %v413_v19 = vpop.f32.mrf.mxu2 }
 0x9c8   :  { %v741_v20 = vpop.eup %740 }
 0x9c9   :  { %438 = vrot.lane.b32.xlu2 %v741_v20, %s857_s8 }
 0x9ca   :  { %v743_v22 = vpop.eup %742 }
 0x9cb   :  { %v419_v23 = vadd.f32 1.0, %v743_v22 }
 0x9cd   :  { %744 = vrcp.f32 %v419_v23  ;;  %v431_v29 = vand.u32 2147483648, %v419_v23  ;;  %vm425_vm10 = vweird.f32 %v419_v23  ;;  %v429_v30 = vand.u32 2147483647, %v419_v23 }
 0x9cf   :  { %v432_v32 = vor.u32 1.1754944e-38, %v431_v29  ;;  %vm430_vm12 = vcmp.eq.f32.partialorder %v429_v30, 8.507059e+37 }
 0x9d3   :  { %v745_v24 = vpop.eup %744 }
 0x9d4   :  { %v421_v25 = vmul.f32 %v745_v24, %v419_v23  ;;  %vm426_vm9 = vweird.f32 %v745_v24 }
 0x9d5   :  { %vm427_vm11 = vmor %vm425_vm10, %vm426_vm9 }
 0x9d6   :  { %v422_v26 = vsub.f32 1.0, %v421_v25 }
 0x9d8   :  { %v423_v27 = vmul.f32 %v745_v24, %v422_v26 }
 0x9da   :  { %v424_v28 = vadd.f32 %v745_v24, %v423_v27 }
 0x9dc   :  { %v428_v31 = vsel %vm427_vm11, %v745_v24, %v424_v28 }
 0x9dd   :  { %v433_v34 = vsel %vm430_vm12, %v432_v32, %v428_v31 }
 0x9de   :  { %v436_v38 = vmul.f32 %v433_v34, %v392_v36 }
 0xa23   :  { %v439_v33 = vpop.permute.xlu2 %438 }
 0xa24   :  { %v441_v35 = vmul.f32 %v439_v33, %v433_v34 }
 0xa26   :  { %443 = vrot.lane.b32.xlu0 %v441_v35, %s857_s8 }
 0xa98   :  { %v444_v39 = vpop.permute.xlu0 %443 }
 0xa99   :  { %v446_v40 = vadd.f32 %v444_v39, %v436_v38 }
 0xa9b   :  { %746 = vtanh.f32 %v446_v40  ;;  %v455_v4 = vsel %vm453_vm13, %v446_v40, %v392_v36 }
 0xaa1   :  { %v747_v41 = vpop.eup %746 }
 0xaa2   :  { %449 = vrot.lane.b32.xlu1 %v747_v41, %s857_s8 }
 0xb14   :  { %v450_v42 = vpop.permute.xlu1 %449 }
 0xb15   :  { %v452_v43 = vmul.f32 %v450_v42, %v433_v34 }
 0xb17   :  { %v454_v44 = vsel %vm453_vm13, %v452_v43, %v391_v12  ;;  %v65_v12 = vpack.c.bf16 %v61_v11, %v60_v10  ;;  %vm642_vm13 = vcmp.gt.s32.totalorder %v931_v37, 7 }
 0xb18   :  { %v458_v45 = vpack.c.bf16 %v454_v44, %v454_v44 }
 0xb19   :  { %670 = vmatmul.msk.bf16.gmra.mxu0 %vm71_vm1, %v65_v12 }
 0xb1a   :  { %460 = vrot.lane.b32.xlu2 %v458_v45, %s854_s30 }
 0xb74   :  { %v461_v46 = vpop.permute.xlu2 %460 }
 0xb75   :  { %688 = vmatmul.msk.bf16.vlgmr.msrb.gmra.mxu3 %vm146_vm7, %v461_v46 }
 0xb96   :  { %v112_v18 = vpop.f32.mrf.mxu0 }
 0xb97   :  { %v113_v19 = vadd.f32 %v922_v8, %v112_v18 }
 0xbf8   :  { %v474_v49 = vpop.f32.mrf.mxu3 }
 0xbf9   :  { %v478_v50 = vadd.f32 %v474_v49, %v110_v48 }
 0xbfb   :  { %748 = vtanh.f32 %v478_v50  ;;  %v689_v53 = vmul.f32 -1.442695, %v478_v50  ;;  %v114_v50 = vpop.f32.mrf.mxu0 }
 0xbfd   :  { %750 = vpow2.f32 %v689_v53 }
 0xc00   :  { %v476_v51 = vpop.f32.mrf.mxu3 }
 0xc01   :  { %v749_v52 = vpop.eup %748  ;;  %v115_v51 = vadd.f32 %v922_v8, %v114_v50 }
 0xc02   :  { %501 = vrot.lane.b32.xlu0 %v749_v52, %s857_s8 }
 0xc03   :  { %v751_v54 = vpop.eup %750 }
 0xc04   :  { %v482_v55 = vadd.f32 1.0, %v751_v54 }
 0xc06   :  { %752 = vrcp.f32 %v482_v55  ;;  %v494_v61 = vand.u32 2147483648, %v482_v55  ;;  %vm488_vm15 = vweird.f32 %v482_v55  ;;  %v492_v62 = vand.u32 2147483647, %v482_v55 }
 0xc08   :  { %v495_v0 = vor.u32 1.1754944e-38, %v494_v61  ;;  %vm493_vm2 = vcmp.eq.f32.partialorder %v492_v62, 8.507059e+37 }
 0xc0c   :  { %v753_v56 = vpop.eup %752 }
 0xc0d   :  { %v484_v57 = vmul.f32 %v753_v56, %v482_v55  ;;  %vm489_vm14 = vweird.f32 %v753_v56 }
 0xc0e   :  { %vm490_vm0 = vmor %vm488_vm15, %vm489_vm14 }
 0xc0f   :  { %v485_v58 = vsub.f32 1.0, %v484_v57 }
 0xc11   :  { %v486_v59 = vmul.f32 %v753_v56, %v485_v58 }
 0xc13   :  { %v487_v60 = vadd.f32 %v753_v56, %v486_v59 }
 0xc15   :  { %v491_v63 = vsel %vm490_vm0, %v753_v56, %v487_v60 }
 0xc16   :  { %v496_v2 = vsel %vm493_vm2, %v495_v0, %v491_v63 }
 0xc17   :  { %v499_v5 = vmul.f32 %v496_v2, %v455_v4 }
 0xc74   :  { %v502_v1 = vpop.permute.xlu0 %501 }
 0xc75   :  { %v504_v3 = vmul.f32 %v502_v1, %v496_v2 }
 0xc77   :  { %506 = vrot.lane.b32.xlu1 %v504_v3, %s857_s8 }
 0xce9   :  { %v507_v6 = vpop.permute.xlu1 %506 }
 0xcea   :  { %v509_v7 = vadd.f32 %v507_v6, %v499_v5 }
 0xcec   :  { %754 = vtanh.f32 %v509_v7  ;;  %v518_v40 = vsel %vm516_vm3, %v509_v7, %v455_v4 }
 0xcf2   :  { %v755_v9 = vpop.eup %754 }
 0xcf3   :  { %512 = vrot.lane.b32.xlu2 %v755_v9, %s857_s8 }
 0xd4d   :  { %v513_v13 = vpop.permute.xlu2 %512 }
 0xd4e   :  { %v515_v14 = vmul.f32 %v513_v13, %v496_v2 }
 0xd50   :  { %v517_v15 = vsel %vm516_vm3, %v515_v14, %v454_v44 }
 0xd51   :  { %v521_v16 = vpack.c.bf16 %v517_v15, %v517_v15 }
 0xd53   :  { %523 = vrot.lane.b32.xlu0 %v521_v16, %s854_s30 }
 0xdc5   :  { %v524_v17 = vpop.permute.xlu0 %523 }
 0xdc6   :  { %690 = vmatmul.msk.bf16.vlgmr.msra.gmra.mxu1 %vm146_vm7, %v524_v17 }
 0xe43   :  { %v537_v20 = vpop.f32.mrf.mxu1 }
 0xe44   :  { %v541_v21 = vadd.f32 %v537_v20, %v113_v19 }
 0xe46   :  { %756 = vtanh.f32 %v541_v21  ;;  %v691_v24 = vmul.f32 -1.442695, %v541_v21 }
 0xe48   :  { %758 = vpow2.f32 %v691_v24 }
 0xe4b   :  { %v539_v22 = vpop.f32.mrf.mxu1 }
 0xe4c   :  { %v757_v23 = vpop.eup %756 }
 0xe4d   :  { %564 = vrot.lane.b32.xlu1 %v757_v23, %s857_s8 }
 0xe4e   :  { %v759_v25 = vpop.eup %758 }
 0xe4f   :  { %v545_v26 = vadd.f32 1.0, %v759_v25 }
 0xe51   :  { %760 = vrcp.f32 %v545_v26  ;;  %v557_v32 = vand.u32 2147483648, %v545_v26  ;;  %vm551_vm4 = vweird.f32 %v545_v26  ;;  %v555_v33 = vand.u32 2147483647, %v545_v26 }
 0xe53   :  { %v558_v35 = vor.u32 1.1754944e-38, %v557_v32  ;;  %vm556_vm6 = vcmp.eq.f32.partialorder %v555_v33, 8.507059e+37 }
 0xe57   :  { %v761_v27 = vpop.eup %760 }
 0xe58   :  { %v547_v28 = vmul.f32 %v761_v27, %v545_v26  ;;  %vm552_vm1 = vweird.f32 %v761_v27 }
 0xe59   :  { %vm553_vm5 = vmor %vm551_vm4, %vm552_vm1 }
 0xe5a   :  { %v548_v29 = vsub.f32 1.0, %v547_v28 }
 0xe5c   :  { %v549_v30 = vmul.f32 %v761_v27, %v548_v29 }
 0xe5e   :  { %v550_v31 = vadd.f32 %v761_v27, %v549_v30 }
 0xe60   :  { %v554_v34 = vsel %vm553_vm5, %v761_v27, %v550_v31 }
 0xe61   :  { %v559_v38 = vsel %vm556_vm6, %v558_v35, %v554_v34 }
 0xe62   :  { %v562_v41 = vmul.f32 %v559_v38, %v518_v40 }
 0xebf   :  { %v565_v36 = vpop.permute.xlu1 %564 }
 0xec0   :  { %v567_v39 = vmul.f32 %v565_v36, %v559_v38 }
 0xec2   :  { %569 = vrot.lane.b32.xlu2 %v567_v39, %s857_s8 }
 0xf1c   :  { %v570_v42 = vpop.permute.xlu2 %569 }
 0xf1d   :  { %v572_v43 = vadd.f32 %v570_v42, %v562_v41 }
 0xf1f   :  { %762 = vtanh.f32 %v572_v43  ;;  %v581_v6 = vsel %vm579_vm8, %v572_v43, %v518_v40 }
 0xf25   :  { %v763_v44 = vpop.eup %762 }
 0xf26   :  { %575 = vrot.lane.b32.xlu0 %v763_v44, %s857_s8 }
 0xf98   :  { %v576_v45 = vpop.permute.xlu0 %575 }
 0xf99   :  { %v578_v46 = vmul.f32 %v576_v45, %v559_v38 }
 0xf9b   :  { %v580_v47 = vsel %vm579_vm8, %v578_v46, %v517_v15 }
 0xf9c   :  { %v584_v48 = vpack.c.bf16 %v580_v47, %v580_v47 }
 0xf9e   :  { %586 = vrot.lane.b32.xlu1 %v584_v48, %s854_s30 }
0x1010   :  { %v587_v49 = vpop.permute.xlu1 %586 }
0x1011   :  { %692 = vmatmul.msk.bf16.vlgmr.msra.gmra.mxu2 %vm146_vm7, %v587_v49 }
0x1094   :  { %v600_v52 = vpop.f32.mrf.mxu2 }
0x1095   :  { %v604_v53 = vadd.f32 %v600_v52, %v115_v51 }
0x1097   :  { %764 = vtanh.f32 %v604_v53  ;;  %v693_v56 = vmul.f32 -1.442695, %v604_v53 }
0x1099   :  { %766 = vpow2.f32 %v693_v56 }
0x109c   :  { %v602_v54 = vpop.f32.mrf.mxu2 }
0x109d   :  { %v765_v55 = vpop.eup %764 }
0x109e   :  { %627 = vrot.lane.b32.xlu2 %v765_v55, %s857_s8 }
0x109f   :  { %v767_v57 = vpop.eup %766 }
0x10a0   :  { %v608_v58 = vadd.f32 1.0, %v767_v57 }
0x10a2   :  { %768 = vrcp.f32 %v608_v58  ;;  %v620_v0 = vand.u32 2147483648, %v608_v58  ;;  %vm614_vm10 = vweird.f32 %v608_v58  ;;  %v618_v8 = vand.u32 2147483647, %v608_v58 }
0x10a4   :  { %v621_v2 = vor.u32 1.1754944e-38, %v620_v0  ;;  %vm619_vm12 = vcmp.eq.f32.partialorder %v618_v8, 8.507059e+37 }
0x10a8   :  { %v769_v59 = vpop.eup %768 }
0x10a9   :  { %v610_v60 = vmul.f32 %v769_v59, %v608_v58  ;;  %vm615_vm9 = vweird.f32 %v769_v59 }
0x10aa   :  { %vm616_vm11 = vmor %vm614_vm10, %vm615_vm9 }
0x10ab   :  { %v611_v61 = vsub.f32 1.0, %v610_v60 }
0x10ad   :  { %v612_v62 = vmul.f32 %v769_v59, %v611_v61 }
0x10af   :  { %v613_v63 = vadd.f32 %v769_v59, %v612_v62 }
0x10b1   :  { %v617_v1 = vsel %vm616_vm11, %v769_v59, %v613_v63 }
0x10b2   :  { %v622_v4 = vsel %vm619_vm12, %v621_v2, %v617_v1 }
0x10b3   :  { %v625_v7 = vmul.f32 %v622_v4, %v581_v6 }
0x10f8   :  { %v628_v3 = vpop.permute.xlu2 %627 }
0x10f9   :  { %v630_v5 = vmul.f32 %v628_v3, %v622_v4 }
0x10fb   :  { %632 = vrot.lane.b32.xlu0 %v630_v5, %s857_s8 }
0x116d   :  { %v633_v9 = vpop.permute.xlu0 %632 }
0x116e   :  { %v635_v10 = vadd.f32 %v633_v9, %v625_v7 }
0x1170   :  { %770 = vtanh.f32 %v635_v10 }
0x1176   :  { %v771_v11 = vpop.eup %770 }
0x1177   :  { %638 = vrot.lane.b32.xlu1 %v771_v11, %s857_s8 }
0x11e9   :  { %v639_v12 = vpop.permute.xlu1 %638 }
0x11ea   :  { %v641_v13 = vmul.f32 %v639_v12, %v622_v4 }
0x11ec   :  { %v643_v14 = vsel %vm642_vm13, %v641_v13, %v580_v47 }
0x11ed   :  { %645 = vrot.lane.b32.xlu2 %v643_v14, %s854_s30 }
0x1247   :  { %v646_v15 = vpop.permute.xlu2 %645 }
0x1248   :  { %648 = vst.msk [vmem:[#allocation8] sm:$0xff] %vm146_vm7, %v646_v15 }
0x1249   :  { %659 = dma.vmem_to_hbm [thread:$0]  %s655_s10, 128, %s657_s13, [#allocation5]  }
0x124a   :  { %848 = dma.done.wait [#allocation5], 128  }
0x124b   :  { %849 = vsyncadd [#allocation5], 4294967168 }
0x124c   :  { %664 = vsyncpa [#allocation4], 1 }
0x124d   :  { %665 = vsyncpa [#allocation7], 1 }
0x124e   :  { %666 = vsyncpa [#allocation5], 1 }

</bundles_post_ra>
